<compile_context>
chip_gen: v5e
topology: v5e:2x2
jax: 0.10.0
libtpu: 0.0.40
codegen_flags: <defaults>
</compile_context>

<pallas_src>
import jax
import jax.numpy as jnp
from jax.experimental import pallas as pl
from jax.experimental.pallas import tpu as pltpu


# ----------------------------------------------------------------------------- kernel
def time_embedding_kernel(t_ref, w1_ref, b1_ref, w2_ref, b2_ref, o_ref):
    # t:(tb,1) f32   w1:(D,H)   b1:(1,H) f32   w2:(H,Dp)   b2:(1,Dp) f32   o:(tb,Dp) f32
    D = w1_ref.shape[0]
    Dh = D // 2

    # Positional encoding built directly as a (tb, D) slab:
    #   pe[:, j]      = sin(t * 2*j/Dh)              for j <  Dh
    #   pe[:, Dh + j] = cos(t * 2*j/Dh) = sin(t * 2*j/Dh + pi/2)
    idx = jax.lax.broadcasted_iota(jnp.int32, (1, D), 1)          # 0 .. D-1
    is_cos = idx >= Dh
    j = jnp.where(is_cos, idx - Dh, idx).astype(jnp.float32)
    freqs = 2.0 * j / Dh                                          # (1, D)
    phase = jnp.where(is_cos, jnp.pi / 2, 0.0).astype(jnp.float32)
    pe = jnp.sin(t_ref[...] * freqs + phase)                      # (tb, D) f32

    # Linear(D, H) -> SiLU -> Linear(H, Dp); MXU operands in w.dtype, accum in f32.
    h = (jnp.dot(pe.astype(w1_ref.dtype), w1_ref[...],
                 preferred_element_type=jnp.float32)
         + b1_ref[...])                                           # (tb, H) f32
    h = h * jax.nn.sigmoid(h)                                     # SiLU (EUP)
    o_ref[...] = (jnp.dot(h.astype(w2_ref.dtype), w2_ref[...],
                          preferred_element_type=jnp.float32)
                  + b2_ref[...]).astype(o_ref.dtype)              # (tb, Dp)


# ----------------------------------------------------------------------------- wrapper
def _round_up(x, m):
    return ((x + m - 1) // m) * m


def _pick_batch_tile(B):
    """Returns (tile_rows, num_blocks)."""
    if B < 16:
        # single block; block dims equal to the full array are always legal
        return B, 1
    # >= 2 blocks so the "parallel" grid axis can be split across both v7x TensorCores;
    # cap tb at 256 so the (tb, H) f32 hidden stays small even at production D on
    # v7x's 64 MiB VMEM.  tb is kept a multiple of 8 (sublane constraint).
    tb = min(256, _round_up(pl.cdiv(B, 2), 8))
    return tb, pl.cdiv(B, tb)


def time_embedding_forward(params, t, *, compute_dtype=jnp.bfloat16):
    B = t.shape[0]
    D = params["w2"].shape[1]          # time_emb_dim
    H = params["w1"].shape[1]          # 4 * time_emb_dim
    assert D % 2 == 0

    # Lane-dense output: pad the out-feature axis to 128 lanes when D < 128.
    Dp = D if D >= 128 else 128
    pad_out = Dp - D

    w1 = params["w1"].astype(compute_dtype)                   # (D, H)
    b1 = params["b1"].reshape(1, H).astype(jnp.float32)
    w2 = params["w2"].astype(compute_dtype)                   # (H, D)
    b2 = params["b2"].reshape(1, D).astype(jnp.float32)
    if pad_out:
        w2 = jnp.pad(w2, ((0, 0), (0, pad_out)))
        b2 = jnp.pad(b2, ((0, 0), (0, pad_out)))

    tb, grid_b = _pick_batch_tile(B)
    Bp = tb * grid_b
    t2 = t.astype(jnp.float32).reshape(B, 1)
    if Bp != B:
        t2 = jnp.pad(t2, ((0, Bp - B), (0, 0)))

    def invariant(shape):
        # grid-invariant operand: constant index_map, single VMEM buffer
        return pl.BlockSpec(shape, lambda i: (0, 0), pipeline_mode=pl.Buffered(1))

    out = pl.pallas_call(
        time_embedding_kernel,
        out_shape=jax.ShapeDtypeStruct((Bp, Dp), jnp.float32),
        grid=(grid_b,),
        in_specs=[
            pl.BlockSpec((tb, 1), lambda i: (i, 0)),    # t (batch-tiled)
            invariant((D, H)),                          # W1
            invariant((1, H)),                          # b1
            invariant((H, Dp)),                         # W2 (out-padded)
            invariant((1, Dp)),                         # b2 (out-padded)
        ],
        out_specs=pl.BlockSpec((tb, Dp), lambda i: (i, 0)),
        compiler_params=pltpu.CompilerParams(
            dimension_semantics=("parallel",),
            vmem_limit_bytes=32 * 1024 * 1024),
    )(t2, w1, b1, w2, b2)

    return out[:B, :D]


# ----------------------------------------------------------------------------- params & reference
def init_params(key, time_emb_dim):
    D = time_emb_dim
    H = 4 * D
    k1, k2, k3, k4 = jax.random.split(key, 4)
    s1 = 1.0 / jnp.sqrt(jnp.float32(D))
    s2 = 1.0 / jnp.sqrt(jnp.float32(H))
    return {
        # stored (in, out) == torch nn.Linear weight.T
        "w1": jax.random.uniform(k1, (D, H), jnp.float32, -s1, s1),
        "b1": jax.random.uniform(k2, (H,), jnp.float32, -s1, s1),
        "w2": jax.random.uniform(k3, (H, D), jnp.float32, -s2, s2),
        "b2": jax.random.uniform(k4, (D,), jnp.float32, -s2, s2),
    }


def time_embedding_ref(params, t):
    # pure-JAX mirror of the PyTorch module (get_pos_enc + Linear/SiLU/Linear)
    D = params["w2"].shape[1]
    Dh = D // 2
    freqs = 2.0 * jnp.arange(Dh, dtype=jnp.float32) / Dh
    arg = t.astype(jnp.float32)[:, None] * freqs[None]
    pe = jnp.concatenate([jnp.sin(arg), jnp.cos(arg)], axis=-1)
    h = pe @ params["w1"] + params["b1"]
    h = h * jax.nn.sigmoid(h)
    return h @ params["w2"] + params["b2"]


# ----------------------------------------------------------------------------- main
if __name__ == "__main__":
    B = 2
    time_emb_dim = 32

    key = jax.random.PRNGKey(0)
    kt, kp = jax.random.split(key)
    t = jax.random.randint(kt, (B,), 0, 100).astype(jnp.float32)   # diffusion timesteps
    params = init_params(kp, time_emb_dim)

    ref = time_embedding_ref(params, t)

    # exact-semantics check: f32 MXU path
    fwd_f32 = jax.jit(lambda p, tt: time_embedding_forward(p, tt, compute_dtype=jnp.float32))
    out_f32 = fwd_f32(params, t)
    jax.block_until_ready(out_f32)
    assert out_f32.shape == (B, time_emb_dim), out_f32.shape
    assert out_f32.dtype == jnp.float32
    assert jnp.allclose(out_f32, ref, atol=1e-3, rtol=1e-3), \
        float(jnp.max(jnp.abs(out_f32 - ref)))

    # default fast path: bf16 MXU operands (half the weight DMA), f32 accumulation
    fwd = jax.jit(time_embedding_forward)
    out = fwd(params, t)
    jax.block_until_ready(out)
    assert out.shape == (B, time_emb_dim), out.shape
    assert out.dtype == jnp.float32
    assert jnp.allclose(out, ref, atol=5e-2, rtol=5e-2), \
        float(jnp.max(jnp.abs(out - ref)))

    print("KERNEL_OK")
</pallas_src>

<mosaic_0001>
module attributes {stable_mosaic.version = 11 : i64} {
  func.func @time_embedding_kernel(%arg0: i32, %arg1: memref<2x1xf32, #tpu.memory_space<vmem>>, %arg2: memref<32x128xf32, #tpu.memory_space<vmem>>, %arg3: memref<1x128xf32, #tpu.memory_space<vmem>>, %arg4: memref<128x128xf32, #tpu.memory_space<vmem>>, %arg5: memref<1x128xf32, #tpu.memory_space<vmem>>, %arg6: memref<2x128xf32, #tpu.memory_space<vmem>>) attributes {dimension_semantics = [#tpu.dimension_semantics<parallel>], iteration_bounds = array<i64: 1>, scalar_prefetch = 0 : i64, scratch_operands = 0 : i64, tpu.core_type = #tpu.core_type<tc>, window_params = [{transform_indices = @transform_0, window_bounds = array<i64: 2, 1>}, {pipeline_mode = #tpu.pipeline_mode<synchronous>, transform_indices = @transform_1, window_bounds = array<i64: 32, 128>}, {pipeline_mode = #tpu.pipeline_mode<synchronous>, transform_indices = @transform_2, window_bounds = array<i64: 1, 128>}, {pipeline_mode = #tpu.pipeline_mode<synchronous>, transform_indices = @transform_3, window_bounds = array<i64: 128, 128>}, {pipeline_mode = #tpu.pipeline_mode<synchronous>, transform_indices = @transform_4, window_bounds = array<i64: 1, 128>}, {transform_indices = @transform_5, window_bounds = array<i64: 2, 128>}]} {
    %0 = tpu.iota {dimensions = array<i32: 1>} : vector<1x32xi32>
    %c16_i32 = arith.constant 16 : i32
    %1 = vector.broadcast %c16_i32 : i32 to vector<1x32xi32>
    %2 = arith.cmpi sge, %0, %1 : vector<1x32xi32>
    %c16_i32_0 = arith.constant 16 : i32
    %3 = vector.broadcast %c16_i32_0 : i32 to vector<1x32xi32>
    %4 = arith.subi %0, %3 : vector<1x32xi32>
    %5 = arith.select %2, %4, %0 : vector<1x32xi1>, vector<1x32xi32>
    %6 = arith.sitofp %5 : vector<1x32xi32> to vector<1x32xf32>
    %cst = arith.constant 2.000000e+00 : f32
    %7 = vector.broadcast %cst : f32 to vector<1x32xf32>
    %8 = arith.mulf %7, %6 : vector<1x32xf32>
    %cst_1 = arith.constant 1.600000e+01 : f32
    %9 = vector.broadcast %cst_1 : f32 to vector<1x32xf32>
    %10 = arith.divf %8, %9 : vector<1x32xf32>
    %cst_2 = arith.constant 1.57079637 : f32
    %cst_3 = arith.constant 0.000000e+00 : f32
    %11 = vector.broadcast %cst_2 : f32 to vector<1x32xf32>
    %12 = vector.broadcast %cst_3 : f32 to vector<1x32xf32>
    %13 = arith.select %2, %11, %12 : vector<1x32xi1>, vector<1x32xf32>
    %c0 = arith.constant 0 : index
    %c0_4 = arith.constant 0 : index
    %14 = vector.load %arg1[%c0, %c0_4] : memref<2x1xf32, #tpu.memory_space<vmem>>, vector<2x1xf32>
    %15 = vector.broadcast %14 : vector<2x1xf32> to vector<2x32xf32>
    %16 = vector.broadcast %10 : vector<1x32xf32> to vector<2x32xf32>
    %17 = arith.mulf %15, %16 : vector<2x32xf32>
    %18 = vector.broadcast %13 : vector<1x32xf32> to vector<2x32xf32>
    %19 = arith.addf %17, %18 : vector<2x32xf32>
    %20 = math.sin %19 : vector<2x32xf32>
    %c0_5 = arith.constant 0 : index
    %c0_6 = arith.constant 0 : index
    %21 = vector.load %arg2[%c0_5, %c0_6] : memref<32x128xf32, #tpu.memory_space<vmem>>, vector<32x128xf32>
    %cst_7 = arith.constant dense<0.000000e+00> : vector<2x128xf32>
    %22 = tpu.matmul %20, %21, %cst_7 {dimension_numbers = #tpu.dot_dimension_numbers<[1], [0], [0], [1], [0, 0, 1, 1], [], []>} : vector<2x32xf32>, vector<32x128xf32>, vector<2x128xf32> -> vector<2x128xf32>
    %c0_8 = arith.constant 0 : index
    %c0_9 = arith.constant 0 : index
    %23 = vector.load %arg3[%c0_8, %c0_9] : memref<1x128xf32, #tpu.memory_space<vmem>>, vector<1x128xf32>
    %24 = vector.broadcast %23 : vector<1x128xf32> to vector<2x128xf32>
    %25 = arith.addf %22, %24 : vector<2x128xf32>
    %26 = arith.negf %25 : vector<2x128xf32>
    %27 = math.exp %26 : vector<2x128xf32>
    %cst_10 = arith.constant 1.000000e+00 : f32
    %28 = vector.broadcast %cst_10 : f32 to vector<2x128xf32>
    %29 = arith.addf %28, %27 : vector<2x128xf32>
    %30 = arith.divf %28, %29 : vector<2x128xf32>
    %31 = arith.mulf %25, %30 : vector<2x128xf32>
    %c0_11 = arith.constant 0 : index
    %c0_12 = arith.constant 0 : index
    %32 = vector.load %arg4[%c0_11, %c0_12] : memref<128x128xf32, #tpu.memory_space<vmem>>, vector<128x128xf32>
    %cst_13 = arith.constant dense<0.000000e+00> : vector<2x128xf32>
    %33 = tpu.matmul %31, %32, %cst_13 {dimension_numbers = #tpu.dot_dimension_numbers<[1], [0], [0], [1], [0, 0, 1, 1], [], []>} : vector<2x128xf32>, vector<128x128xf32>, vector<2x128xf32> -> vector<2x128xf32>
    %c0_14 = arith.constant 0 : index
    %c0_15 = arith.constant 0 : index
    %34 = vector.load %arg5[%c0_14, %c0_15] : memref<1x128xf32, #tpu.memory_space<vmem>>, vector<1x128xf32>
    %35 = vector.broadcast %34 : vector<1x128xf32> to vector<2x128xf32>
    %36 = arith.addf %33, %35 : vector<2x128xf32>
    %c0_16 = arith.constant 0 : index
    %c0_17 = arith.constant 0 : index
    %37 = vector.load %arg6[%c0_16, %c0_17] : memref<2x128xf32, #tpu.memory_space<vmem>>, vector<2x128xf32>
    tpu.vector_store %arg6[%c0_16, %c0_17], %36 {strides = array<i32>} : memref<2x128xf32, #tpu.memory_space<vmem>>, vector<2x128xf32>,
    return
  }
  func.func @transform_0(%arg0: i32) -> (i32, i32) {
    %c0_i32 = arith.constant 0 : i32
    %c0_i32_0 = arith.constant 0 : i32
    return %arg0, %c0_i32 : i32, i32
  }
  func.func @transform_1(%arg0: i32) -> (i32, i32) {
    %c0_i32 = arith.constant 0 : i32
    %c0_i32_0 = arith.constant 0 : i32
    %c0_i32_1 = arith.constant 0 : i32
    return %c0_i32, %c0_i32_0 : i32, i32
  }
  func.func @transform_2(%arg0: i32) -> (i32, i32) {
    %c0_i32 = arith.constant 0 : i32
    %c0_i32_0 = arith.constant 0 : i32
    %c0_i32_1 = arith.constant 0 : i32
    return %c0_i32, %c0_i32_0 : i32, i32
  }
  func.func @transform_3(%arg0: i32) -> (i32, i32) {
    %c0_i32 = arith.constant 0 : i32
    %c0_i32_0 = arith.constant 0 : i32
    %c0_i32_1 = arith.constant 0 : i32
    return %c0_i32, %c0_i32_0 : i32, i32
  }
  func.func @transform_4(%arg0: i32) -> (i32, i32) {
    %c0_i32 = arith.constant 0 : i32
    %c0_i32_0 = arith.constant 0 : i32
    %c0_i32_1 = arith.constant 0 : i32
    return %c0_i32, %c0_i32_0 : i32, i32
  }
  func.func @transform_5(%arg0: i32) -> (i32, i32) {
    %c0_i32 = arith.constant 0 : i32
    %c0_i32_0 = arith.constant 0 : i32
    return %arg0, %c0_i32 : i32, i32
  }
}

</mosaic_0001>

<bundles_post_ra>
// kernel: _lambda_.1
= control target key start
LH: loop header
LB: loop body
LE: loop exit
PB: predicated region body
PF: predicated region fallthrough
CT: control target
= control target key end

     0   :  { %v360_v1 = vmov 0   ;;  %s533_s0 = inlined_call_operand.vmem [shape: f32[2,1], index: 0, kind: input, shape index: {}]   ;;  %s534_s1 = inlined_call_operand.vmem [shape: f32[32,128], index: 1, kind: input, shape index: {}]   ;;  %s535_s2 = inlined_call_operand.vmem [shape: f32[1,128], index: 2, kind: input, shape index: {}]   ;;  %s536_s3 = inlined_call_operand.vmem [shape: f32[128,128], index: 3, kind: input, shape index: {}]   ;;  %s537_s4 = inlined_call_operand.vmem [shape: f32[1,128], index: 4, kind: input, shape index: {}]   ;;  %s538_s5 = inlined_call_operand.hbm [shape: f32[2,128], index: 5, kind: output, shape index: {}]  }
   0x1   :  { %v37_v0 = vld [vmem:[%s533_s0] sm:$0x3]  ;;  %325 = vset.pattern.permute.xlu0 %v360_v1 }
   0x2   :  { %40 = vperm.xlu0 %325, %v37_v0  }
   0x3   :  { %10 = vsyncpa [#allocation3], 0  ;;  %v361_v2 = vmov 16.0   ;;  %v21_v3 = vlaneseq  ;;  %v203_v13 = vld [vmem:[%s534_s1 + $0x18] sm:$0xff]  ;;  %v202_v14 = vld [vmem:[%s534_s1 + $0x10] sm:$0xff]  ;;  %v362_v21 = vmov 0.0  }
   0x4   :  { %328 = vrcp.f32 %v361_v2  ;;  %224 = vmatpush.msra.mxu0 %v203_v13  ;;  %v201_v16 = vld [vmem:[%s534_s1 + $0x8] sm:$0xff]  ;;  %v200_v18 = vld [vmem:[%s534_s1] sm:$0xff]  ;;  %v363_v36 = vmov 2102212464   ;;  %v364_v38 = vmov 920167782  }
   0x5   :  { %v22_v5 = vand.u32 127, %v21_v3  ;;  %v365_v41 = vmov 1326507024   ;;  %v366_v43 = vmov 683565275   ;;  %s369_s8 = smov [#allocation2]  }
   0x6   :  { %225 = vmatpush.msra.mxu0 %v202_v14  ;;  %v367_v45 = vmov 2475754826   ;;  %v368_v48 = vmov 2131351028   ;;  %s298_s9 = sshll.u32 %s369_s8, 4  ;;  %s300_s12 = sshll.u32 %s538_s5, 4  ;;  %s299_s9 = int_to_ptr.vmem [resolvable:$true] %s298_s9  ;;  %s301_s12 = int_to_ptr.hbm [resolvable:$true] %s300_s12 }
   0x7   :  { %v309_v7 = vadd.s32 4294967280, %v22_v5  ;;  %vm23_vm0 = vcmp.ge.s32.totalorder %v22_v5, 16 }
   0x8   :  { %226 = vmatpush.msra.mxu0 %v201_v16  ;;  %v36_v22 = vsel %vm23_vm0, 1.5707964, %v362_v21 }
   0x9   :  { %v25_v9 = vsel %vm23_vm0, %v309_v7, %v22_v5 }
   0xa   :  { %v329_v4 = vpop.eup %328  ;;  %v26_v11 = vcvt.s32.f32 %v25_v9  ;;  %227 = vmatpush.msra.mxu0 %v200_v18 }
   0xb   :  { %v29_v6 = vmul.f32 16.0, %v329_v4  ;;  %vm33_vm1 = vweird.f32 %v329_v4 }
   0xc   :  { %v27_v15 = vmul.f32 2.0, %v26_v11 }
   0xd   :  { %v30_v8 = vsub.f32 1.0, %v29_v6 }
   0xf   :  { %v31_v10 = vmul.f32 %v329_v4, %v30_v8 }
  0x11   :  { %v32_v12 = vadd.f32 %v329_v4, %v31_v10 }
  0x13   :  { %v34_v17 = vsel %vm33_vm1, %v329_v4, %v32_v12 }
  0x14   :  { %v35_v19 = vmul.f32 %v34_v17, %v27_v15 }
  0x74   :  { %v41_v20 = vpop.permute.xlu0 %40 }
  0x75   :  { %v43_v23 = vmul.f32 %v41_v20, %v35_v19 }
  0x77   :  { %v418_v24 = vadd.f32 %v43_v23, %v36_v22 }
  0x79   :  { %v48_v25 = vand.u32 2139095040, %v418_v24  ;;  %v45_v28 = vand.u32 2147483647, %v418_v24  ;;  %vm47_vm14 = vcmp.lt.s32.totalorder %v418_v24, 0 }
  0x7b   :  { %v49_v26 = vshrl.u32 %v48_v25, 23  ;;  %v52_v30 = vand.u32 8388607, %v45_v28  ;;  %vm46_vm15 = vcmp.le.f32.partialorder %v45_v28, 0.7853982 }
  0x7d   :  { %v310_v27 = vadd.s32 4294967169, %v49_v26  ;;  %v53_v34 = vor.u32 8388608, %v52_v30 }
  0x7f   :  { %v55_v29 = vadd.s32 1, %v310_v27  ;;  %v433_v55 = vshll.u32 %v53_v34, 8 }
  0x81   :  { %vm56_vm2 = vcmp.gt.s32.totalorder %v55_v29, 0  ;;  %v94_v2 = vand.u32 65535, %v433_v55  ;;  %v95_v4 = vshrl.u32 %v433_v55, 16 }
  0x82   :  { %v57_v31 = vsel %vm56_vm2, %v55_v29, 0 }
  0x83   :  { %v59_v32 = vand.u32 31, %v57_v31  ;;  %v426_v35 = vshrl.u32 %v57_v31, 5 }
  0x85   :  { %v424_v33 = vsub.s32 32, %v59_v32  ;;  %v71_v37 = vshll.u32 %v363_v36, %v59_v32  ;;  %v74_v39 = vshll.u32 %v364_v38, %v59_v32  ;;  %v62_v44 = vshll.u32 %v366_v43, %v59_v32 }
  0x86   :  { %v65_v47 = vshll.u32 %v367_v45, %v59_v32  ;;  %v68_v50 = vshll.u32 %v368_v48, %v59_v32  ;;  %vm80_vm3 = vcmp.lt.s32.totalorder %v426_v35, 4  ;;  %vm77_vm4 = vcmp.lt.s32.totalorder %v426_v35, 1 }
  0x87   :  { %v72_v40 = vshrl.u32 %v364_v38, %v424_v33  ;;  %v75_v42 = vshrl.u32 %v365_v41, %v424_v33  ;;  %v63_v46 = vshrl.u32 %v367_v45, %v424_v33  ;;  %v66_v49 = vshrl.u32 %v368_v48, %v424_v33 }
  0x88   :  { %v69_v51 = vshrl.u32 %v363_v36, %v424_v33  ;;  %vm79_vm5 = vcmp.lt.s32.totalorder %v426_v35, 3  ;;  %vm78_vm6 = vcmp.lt.s32.totalorder %v426_v35, 2  ;;  %v61_v29 = vshrl.u32 %v366_v43, %v424_v33 }
  0x89   :  { %v73_v52 = vor.u32 %v72_v40, %v71_v37  ;;  %v76_v53 = vor.u32 %v75_v42, %v74_v39  ;;  %v64_v54 = vor.u32 %v63_v46, %v62_v44  ;;  %v67_v56 = vor.u32 %v66_v49, %v65_v47 }
  0x8a   :  { %v70_v57 = vor.u32 %v69_v51, %v68_v50 }
  0x8b   :  { %v86_v58 = vsel %vm80_vm3, %v73_v52, 920167782  ;;  %v90_v59 = vsel %vm80_vm3, %v76_v53, 1326507024  ;;  %v85_v60 = vsel %vm77_vm4, %v64_v54, %v67_v56  ;;  %v81_v37 = vsel %vm77_vm4, %v61_v29, %v64_v54 }
  0x8c   :  { %v87_v61 = vsel %vm79_vm5, %v70_v57, %v86_v58  ;;  %v89_v62 = vsel %vm77_vm4, %v67_v56, %v70_v57  ;;  %v91_v0 = vsel %vm79_vm5, %v73_v52, %v90_v59  ;;  %v82_v25 = vsel %vm80_vm3, %v70_v57, 2102212464 }
  0x8d   :  { %v88_v63 = vsel %vm78_vm6, %v85_v60, %v87_v61  ;;  %v92_v3 = vsel %vm78_vm6, %v89_v62, %v91_v0  ;;  %v83_v38 = vsel %vm79_vm5, %v67_v56, %v82_v25  ;;  %vm208_vm3 = vcmask 261120  }
  0x8e   :  { %v118_v5 = vand.u32 65535, %v88_v63  ;;  %v119_v6 = vshrl.u32 %v88_v63, 16  ;;  %v96_v7 = vand.u32 65535, %v92_v3  ;;  %v97_v8 = vshrl.u32 %v92_v3, 16 }
  0x8f   :  { %v84_v43 = vsel %vm78_vm6, %v81_v37, %v83_v38  ;;  %vm188_vm4 = vweird.f32 %v418_v24 }
  0x90   :  { %v121_v9 = vmul.u32 %v119_v6, %v94_v2  ;;  %v122_v10 = vmul.u32 %v118_v5, %v95_v4  ;;  %v99_v11 = vmul.u32 %v97_v8, %v94_v2  ;;  %v100_v12 = vmul.u32 %v96_v7, %v95_v4 }
  0x91   :  { %v120_v13 = vmul.u32 %v118_v5, %v94_v2  ;;  %v98_v15 = vmul.u32 %v96_v7, %v94_v2  ;;  %v123_v17 = vmul.u32 %v119_v6, %v95_v4  ;;  %v101_v18 = vmul.u32 %v97_v8, %v95_v4 }
  0x92   :  { %v124_v14 = vshll.u32 %v121_v9, 16  ;;  %v102_v16 = vshll.u32 %v99_v11, 16  ;;  %v126_v19 = vshll.u32 %v122_v10, 16  ;;  %v104_v21 = vshll.u32 %v100_v12, 16 }
  0x93   :  { %v125_v34 = vshrl.u32 %v121_v9, 16  ;;  %v103_v39 = vshrl.u32 %v99_v11, 16  ;;  %v127_v41 = vshrl.u32 %v122_v10, 16  ;;  %v105_v44 = vshrl.u32 %v100_v12, 16 }
  0x94   :  { %vm128_vm7 = vc.u32 %v120_v13, %v124_v14  ;;  %v130_v20 = vadd.s32 %v124_v14, %v120_v13  ;;  %vm106_vm8 = vc.u32 %v98_v15, %v102_v16  ;;  %v108_v22 = vadd.s32 %v102_v16, %v98_v15 }
  0x95   :  { %v129_v23 = vsel %vm128_vm7, 1, %v360_v1  ;;  %v107_v26 = vsel %vm106_vm8, 1, %v360_v1  ;;  %v138_v48 = vmul.u32 %v433_v55, %v84_v43  ;;  %v260_v43 = vld [vmem:[%s536_s3 + $0x40] sm:$0xff] }
  0x96   :  { %v131_v27 = vadd.s32 %v129_v23, %v123_v17  ;;  %vm132_vm9 = vc.u32 %v130_v20, %v126_v19  ;;  %v109_v30 = vadd.s32 %v107_v26, %v101_v18  ;;  %vm110_vm10 = vc.u32 %v108_v22, %v104_v21 }
  0x97   :  { %v133_v31 = vsel %vm132_vm9, 1, %v360_v1  ;;  %v111_v32 = vsel %vm110_vm10, 1, %v360_v1  ;;  %v134_v1 = vadd.s32 %v130_v20, %v126_v19 }
  0x98   :  { %v135_v36 = vadd.s32 %v133_v31, %v131_v27  ;;  %v113_v40 = vadd.s32 %v111_v32, %v109_v30 }
  0x9a   :  { %v136_v42 = vadd.s32 %v135_v36, %v125_v34  ;;  %v114_v33 = vadd.s32 %v113_v40, %v103_v39  ;;  %v267_v39 = vld [vmem:[%s536_s3 + $0x78] sm:$0xff]  ;;  %v266_v40 = vld [vmem:[%s536_s3 + $0x70] sm:$0xff] }
  0x9b   :  { %272 = vmatpush.msra.mxu1 %v267_v39 }
  0x9c   :  { %v137_v45 = vadd.s32 %v136_v42, %v127_v41  ;;  %v115_v46 = vadd.s32 %v114_v33, %v105_v44  ;;  %v265_v41 = vld [vmem:[%s536_s3 + $0x68] sm:$0xff]  ;;  %v263_v42 = vld [vmem:[%s536_s3 + $0x58] sm:$0xff]  ;;  %v262_v44 = vld [vmem:[%s536_s3 + $0x50] sm:$0xff] }
  0x9d   :  { %273 = vmatpush.msra.mxu1 %v266_v40  ;;  %v261_v33 = vld [vmem:[%s536_s3 + $0x48] sm:$0xff] }
  0x9e   :  { %v141_v47 = vadd.s32 1, %v137_v45  ;;  %vm140_vm11 = vc.u32 %v115_v46, %v134_v1  ;;  %v139_v60 = vadd.s32 %v134_v1, %v115_v46  ;;  %v258_v46 = vld [vmem:[%s536_s3 + $0x30] sm:$0xff]  ;;  %v257_v1 = vld [vmem:[%s536_s3 + $0x28] sm:$0xff] }
  0x9f   :  { %274 = vmatpush.msra.mxu1 %v265_v41 }
  0xa0   :  { %v142_v49 = vsel %vm140_vm11, %v141_v47, %v137_v45  ;;  %v259_v45 = vld [vmem:[%s536_s3 + $0x38] sm:$0xff]  ;;  %v256_v47 = vld [vmem:[%s536_s3 + $0x20] sm:$0xff] }
  0xa1   :  { %v143_v50 = vadd.s32 %v142_v49, %v138_v48  ;;  %v255_v48 = vld [vmem:[%s536_s3 + $0x18] sm:$0xff]  ;;  %v254_v49 = vld [vmem:[%s536_s3 + $0x10] sm:$0xff] }
  0xa3   :  { %v144_v51 = vadd.s32 536870912, %v143_v50 }
  0xa5   :  { %v145_v52 = vshrl.u32 %v144_v51, 30  ;;  %v253_v51 = vld [vmem:[%s536_s3 + $0x8] sm:$0xff] }
  0xa7   :  { %v146_v53 = vshll.u32 %v145_v52, 30  ;;  %v169_v10 = vsub.s32 4, %v145_v52 }
  0xa9   :  { %v147_v54 = vsub.s32 %v143_v50, %v146_v53  ;;  %v170_v15 = vsel %vm47_vm14, %v169_v10, %v145_v52  ;;  %v326_v50 = vld [vmem:[%s535_s2] ss:$0 sm:$0xff] }
  0xaa   :  { %v172_v18 = vsel %vm46_vm15, 0, %v170_v15  ;;  %v252_v53 = vld [vmem:[%s536_s3] sm:$0xff] }
  0xab   :  { %vm148_vm12 = vcmp.lt.s32.totalorder %v147_v54, 0  ;;  %v149_v56 = vsub.s32 0, %v147_v54  ;;  %v189_v23 = vadd.s32 3, %v172_v18 }
  0xad   :  { %v150_v57 = vsel %vm148_vm12, %v149_v56, %v147_v54  ;;  %v190_v29 = vand.u32 3, %v189_v23 }
  0xae   :  { %v151_v58 = vclz %v150_v57 }
  0xaf   :  { %vm192_vm0 = vcmp.eq.s32.totalorder %v190_v29, 0  ;;  %vm195_vm1 = vcmp.eq.s32.totalorder %v190_v29, 2  ;;  %vm191_vm2 = vcmp.lt.s32.totalorder %v190_v29, 2 }
  0xb0   :  { %v311_v59 = vadd.s32 4294967294, %v151_v58 }
  0xb2   :  { %vm312_vm13 = vcmp.lt.s32.totalorder %v311_v59, 0 }
  0xb3   :  { %v154_v35 = vsel %vm312_vm13, 0, %v311_v59 }
  0xb4   :  { %v155_v61 = vsub.s32 32, %v154_v35  ;;  %v159_v62 = vsub.s32 4294967266, %v154_v35  ;;  %v156_v63 = vshll.u32 %v147_v54, %v154_v35 }
  0xb6   :  { %v157_v0 = vshrl.u32 %v139_v60, %v155_v61  ;;  %v160_v55 = vadd.s32 127, %v159_v62 }
  0xb8   :  { %v158_v2 = vor.u32 %v157_v0, %v156_v63  ;;  %v161_v3 = vshll.u32 %v160_v55, 23 }
  0xba   :  { %v162_v4 = vor.u32 4788187, %v161_v3  ;;  %v165_v6 = vcvt.s32.f32 %v158_v2 }
  0xbc   :  { %v163_v5 = vand.u32 2147483647, %v162_v4 }
  0xbe   :  { %v166_v7 = vmul.f32 %v165_v6, %v163_v5  ;;  %v327_v5 = vld [vmem:[%s537_s4] ss:$0 sm:$0xff] }
  0xc0   :  { %v167_v8 = vxor.u32 2147483648, %v166_v7 }
  0xc2   :  { %v168_v9 = vsel %vm47_vm14, %v167_v8, %v166_v7 }
  0xc3   :  { %v171_v11 = vsel %vm46_vm15, %v418_v24, %v168_v9  ;;  %v264_v24 = vld [vmem:[%s536_s3 + $0x60] sm:$0xff] }
  0xc4   :  { %v173_v12 = vmul.f32 %v171_v11, %v171_v11  ;;  %275 = vmatpush.msra.mxu1 %v264_v24 }
  0xc6   :  { %v174_v13 = vmul.f32 -0.001358992, %v173_v12  ;;  %v181_v14 = vmul.f32 -0.00019511016, %v173_v12  ;;  %276 = vmatpush.msra.mxu1 %v263_v42 }
  0xc8   :  { %v175_v16 = vadd.f32 0.041655596, %v174_v13  ;;  %v182_v17 = vadd.f32 0.008332121, %v181_v14  ;;  %277 = vmatpush.msra.mxu1 %v262_v44 }
  0xca   :  { %v176_v19 = vmul.f32 %v175_v16, %v173_v12  ;;  %v183_v20 = vmul.f32 %v182_v17, %v173_v12  ;;  %278 = vmatpush.msra.mxu1 %v261_v33 }
  0xcc   :  { %v177_v21 = vadd.f32 -0.4999988, %v176_v19  ;;  %v184_v22 = vadd.f32 -0.16666654, %v183_v20  ;;  %279 = vmatpush.msra.mxu1 %v260_v43 }
  0xce   :  { %v178_v25 = vmul.f32 %v177_v21, %v173_v12  ;;  %v185_v26 = vmul.f32 %v184_v22, %v173_v12  ;;  %280 = vmatpush.msra.mxu1 %v259_v45 }
  0xd0   :  { %v179_v27 = vadd.f32 1.0, %v178_v25  ;;  %v186_v28 = vadd.f32 1.0, %v185_v26  ;;  %281 = vmatpush.msra.mxu1 %v258_v46 }
  0xd2   :  { %v187_v30 = vmul.f32 %v186_v28, %v171_v11  ;;  %v196_v31 = vxor.u32 2147483648, %v179_v27  ;;  %282 = vmatpush.msra.mxu1 %v257_v1 }
  0xd4   :  { %v193_v32 = vxor.u32 2147483648, %v187_v30  ;;  %v197_v36 = vsel %vm195_vm1, %v196_v31, %v187_v30  ;;  %283 = vmatpush.msra.mxu1 %v256_v47 }
  0xd6   :  { %v194_v34 = vsel %vm192_vm0, %v179_v27, %v193_v32  ;;  %284 = vmatpush.msra.mxu1 %v255_v48 }
  0xd7   :  { %v198_v37 = vsel %vm191_vm2, %v194_v34, %v197_v36 }
  0xd8   :  { %v199_v38 = vsel %vm188_vm4, nan, %v198_v37  ;;  %285 = vmatpush.msra.mxu1 %v254_v49 }
  0xd9   :  { %313 = vmatmul.msk.f32.vlgmr.msra.gmra.mxu0 %vm208_vm3, %v199_v38 }
  0xda   :  { %286 = vmatpush.msra.mxu1 %v253_v51 }
  0xdc   :  { %287 = vmatpush.msra.mxu1 %v252_v53 }
 0x156   :  { %v229_v52 = vpop.f32.mrf.mxu0 }
 0x157   :  { %v230_v54 = vadd.f32 %v326_v50, %v229_v52 }
 0x159   :  { %v314_v56 = vmul.f32 -1.442695, %v230_v54 }
 0x15b   :  { %330 = vpow2.f32 %v314_v56 }
 0x161   :  { %v331_v57 = vpop.eup %330 }
 0x162   :  { %v235_v58 = vadd.f32 1.0, %v331_v57 }
 0x164   :  { %332 = vrcp.f32 %v235_v58  ;;  %v247_v61 = vand.u32 2147483648, %v235_v58  ;;  %v245_v63 = vand.u32 2147483647, %v235_v58  ;;  %vm241_vm6 = vweird.f32 %v235_v58 }
 0x166   :  { %v248_v55 = vor.u32 1.1754944e-38, %v247_v61  ;;  %vm246_vm8 = vcmp.eq.f32.partialorder %v245_v63, 8.507059e+37 }
 0x16a   :  { %v333_v59 = vpop.eup %332 }
 0x16b   :  { %v237_v35 = vmul.f32 %v333_v59, %v235_v58  ;;  %vm242_vm5 = vweird.f32 %v333_v59 }
 0x16c   :  { %vm243_vm7 = vmor %vm241_vm6, %vm242_vm5 }
 0x16d   :  { %v238_v60 = vsub.f32 1.0, %v237_v35 }
 0x16f   :  { %v239_v62 = vmul.f32 %v333_v59, %v238_v60 }
 0x171   :  { %v240_v0 = vadd.f32 %v333_v59, %v239_v62 }
 0x173   :  { %v244_v2 = vsel %vm243_vm7, %v333_v59, %v240_v0 }
 0x174   :  { %v249_v3 = vsel %vm246_vm8, %v248_v55, %v244_v2 }
 0x175   :  { %v251_v4 = vmul.f32 %v249_v3, %v230_v54 }
 0x177   :  { %288 = vmatmul.f32.vlgmr.msra.gmra.mxu1 %v251_v4 }
 0x1f4   :  { %v289_v6 = vpop.f32.mrf.mxu1 }
 0x1f5   :  { %v290_v7 = vadd.f32 %v327_v5, %v289_v6 }
 0x1f7   :  { %292 = vst [vmem:[#allocation2] sm:$0x3] %v290_v7 }
 0x1f8   :  { %303 = dma.vmem_to_hbm [thread:$0]  %s299_s9, 32, %s301_s12, [#allocation3]  }
 0x1f9   :  { %358 = dma.done.wait [#allocation3], 32  }
 0x1fa   :  { %359 = vsyncadd [#allocation3], 4294967264 }
 0x1fb   :  { %308 = vsyncpa [#allocation3], 1 }

</bundles_post_ra>
